<compile_context>
chip_gen: v7x
topology: tpu7x:2x2x1
jax: 0.10.0
libtpu: 0.0.40
codegen_flags: <defaults>
</compile_context>

<pallas_src>
import functools

import jax
import jax.numpy as jnp
from jax.experimental import pallas as pl
from jax.experimental.pallas import tpu as pltpu

K = 3
D_IN, H1, H2, H3 = 1, 50, 100, 50
PAD = 128            # padded feature count (sublane axis of activations)
HEAD_ROWS = 16       # 3*K = 9 head rows, padded to a multiple of 8 sublanes
TB_MAX = 2048        # max batch tile (lane axis); multiple of 128

# Column indices inside the merged (PAD, 8) "cols" operand.
_C_W1, _C_B1, _C_B2, _C_B3, _C_BH, _C_PI, _C_MU = range(7)


def _mdn_kernel(x_ref, cols_ref, w2_ref, w3_ref, wh_ref, out_ref, *, ew_dtype):
    """One batch tile (TB lanes) of the full MDN forward, feature-major.

    x_ref   : (1, TB)         f32  input values, batch on the lane axis
    cols_ref: (PAD, 8)        f32  merged small vectors (see _C_* indices)
    w2_ref  : (PAD, PAD)      mm   W2^T  (out-features x in-features)
    w3_ref  : (PAD, PAD)      mm   W3^T
    wh_ref  : (HEAD_ROWS,PAD) mm   packed heads^T: rows 0..2 pi, 3..5 mu,
                                   6..8 sigSq, 9..15 zero padding
    out_ref : (HEAD_ROWS,TB)  f32  packed outputs, same row layout as wh
    """
    mm_dtype = w2_ref.dtype

    cols = cols_ref[...]                                    # (PAD, 8) f32
    w1c = cols[:, _C_W1:_C_W1 + 1]                          # (PAD, 1)
    b1c = cols[:, _C_B1:_C_B1 + 1]
    b2c = cols[:, _C_B2:_C_B2 + 1]
    b3c = cols[:, _C_B3:_C_B3 + 1]
    bhc = cols[:HEAD_ROWS, _C_BH:_C_BH + 1]                 # (16, 1)
    is_pi = cols[:HEAD_ROWS, _C_PI:_C_PI + 1] > 0.5         # (16, 1) bool
    is_mu = cols[:HEAD_ROWS, _C_MU:_C_MU + 1] > 0.5

    def act(pre):
        # tanh in ew_dtype (bf16 on the fast path -> 2x EUP on v6e/v7x, no
        # extra cast before the next MXU matmul); f32 on the validation path.
        return jnp.tanh(pre.astype(ew_dtype)).astype(mm_dtype)

    x = x_ref[...]                                          # (1, TB) f32
    # Layer 1 has fan_in == 1: an outer-product broadcast on the VPU, no MXU.
    h1 = act(w1c * x + b1c)                                 # (PAD, TB)
    h2 = act(jnp.dot(w2_ref[...], h1,
                     preferred_element_type=jnp.float32) + b2c)
    z = act(jnp.dot(w3_ref[...], h2,
                    preferred_element_type=jnp.float32) + b3c)

    # Packed head matmul: only 16 output rows (pi | mu | sigSq | padding).
    heads = (jnp.dot(wh_ref[...], z,
                     preferred_element_type=jnp.float32) + bhc)   # (16, TB)

    # No softmax max-shift: z in [-1, 1] and head weights are O(1/sqrt(50)),
    # so |logits| < ~8 and exp() cannot overflow in f32.  One exp produces
    # both the softmax numerators (pi rows) and exp(sigma logits).
    e = jnp.exp(heads)                                      # (16, TB) f32
    denom = jnp.sum(jnp.where(is_pi, e, 0.0), axis=0, keepdims=True)  # (1,TB)
    pi = e * pl.reciprocal(denom, approx=False)

    # rows 0..2: pi, 3..5: mu (raw), 6..8: sigSq = exp(logit),
    # rows 9..15: exp(0) = 1 padding — never consume the packed output raw;
    # the wrapper slices rows 0..8 only.
    out_ref[...] = jnp.where(is_pi, pi, jnp.where(is_mu, heads, e))


def _pack_params(params, matmul_dtype):
    """Transpose / pad PyTorch-style params into feature-major operands."""
    w1, b1 = params["lH1"]       # (1, 50),  (50,)
    w2, b2 = params["lH2"]       # (50, 100),(100,)
    w3, b3 = params["lH3"]       # (100, 50),(50,)
    wpi, bpi = params["lPi"]     # (50, 3),  (3,)
    wmu, bmu = params["lMu"]
    wsg, bsg = params["lSigSq"]

    def pad_wT(w, dtype, rows=PAD):
        # (in, out) weight -> transposed (out, in), zero-padded.
        out = jnp.zeros((rows, PAD), dtype)
        return out.at[: w.shape[1], : w.shape[0]].set(w.T.astype(dtype))

    w2T = pad_wT(w2, matmul_dtype)
    w3T = pad_wT(w3, matmul_dtype)
    wh = jnp.concatenate([wpi, wmu, wsg], axis=1)           # (50, 9)
    whT = pad_wT(wh, matmul_dtype, rows=HEAD_ROWS)          # (16, 128)

    cols = jnp.zeros((PAD, 8), jnp.float32)
    cols = cols.at[:H1, _C_W1].set(w1[0].astype(jnp.float32))
    cols = cols.at[:H1, _C_B1].set(b1.astype(jnp.float32))
    cols = cols.at[:H2, _C_B2].set(b2.astype(jnp.float32))
    cols = cols.at[:H3, _C_B3].set(b3.astype(jnp.float32))
    bh = jnp.concatenate([bpi, bmu, bsg]).astype(jnp.float32)
    cols = cols.at[: 3 * K, _C_BH].set(bh)
    cols = cols.at[0:K, _C_PI].set(1.0)                     # pi-row mask
    cols = cols.at[K:2 * K, _C_MU].set(1.0)                 # mu-row mask
    return cols, w2T, w3T, whT


def gauss_nn_mle_pallas(x, params, *, matmul_dtype=jnp.bfloat16,
                        elementwise_dtype=None, tb_max=TB_MAX):
    """x: (N, 1) float32  ->  (pi, mu, sigSq), each (N, K) float32."""
    if elementwise_dtype is None:
        # Fast path: bf16 tanh (v6e/v7x EUP win).  Pass jnp.float32 on v5e.
        elementwise_dtype = matmul_dtype

    n = x.shape[0]
    n128 = max(128, ((n + 127) // 128) * 128)   # batch lives on the lane axis

    # Batch tile: as large as VMEM comfortably allows, but aim for >= 4 grid
    # steps when N permits so v7x's two TensorCores stay balanced and output
    # DMA overlaps compute.  TODO(synk): sweep tb_max in {1024, 2048, 4096}
    # per generation (v7x has only 64 MiB VMEM).
    tb = min(tb_max, n128)
    if n128 >= 4 * 128 and n128 // tb < 4:
        tb = max(128, ((n128 // 4) // 128) * 128)
    n_pad = ((n128 + tb - 1) // tb) * tb
    grid = n_pad // tb
    if grid > 1 and grid % 2 == 1:              # even split across two cores
        grid += 1
        n_pad = grid * tb

    x_row = jnp.zeros((1, n_pad), jnp.float32)
    x_row = x_row.at[0, :n].set(x[:, 0].astype(jnp.float32))

    cols, w2T, w3T, whT = _pack_params(params, matmul_dtype)
    kernel = functools.partial(_mdn_kernel, ew_dtype=elementwise_dtype)

    # NOTE: weight / cols index_maps are constant across the grid, so the
    # pipeline keeps them resident and does not re-DMA them per step.
    out = pl.pallas_call(
        kernel,
        grid=(grid,),
        in_specs=[
            pl.BlockSpec((1, tb), lambda i: (0, i)),            # x, lane-dense
            pl.BlockSpec((PAD, 8), lambda i: (0, 0)),           # merged cols
            pl.BlockSpec((PAD, PAD), lambda i: (0, 0)),         # W2^T
            pl.BlockSpec((PAD, PAD), lambda i: (0, 0)),         # W3^T
            pl.BlockSpec((HEAD_ROWS, PAD), lambda i: (0, 0)),   # heads^T
        ],
        out_specs=pl.BlockSpec((HEAD_ROWS, tb), lambda i: (0, i)),
        out_shape=jax.ShapeDtypeStruct((HEAD_ROWS, n_pad), jnp.float32),
        compiler_params=pltpu.CompilerParams(
            dimension_semantics=("parallel",),
            vmem_limit_bytes=32 * 1024 * 1024),
    )(x_row, cols, w2T, w3T, whT)

    pi = out[0:K, :n].T
    mu = out[K:2 * K, :n].T
    sig_sq = out[2 * K:3 * K, :n].T
    return pi, mu, sig_sq


def init_params(key):
    """Deterministic init matching nn.Linear default (U[-1/sqrt(fan_in), ...])."""
    def linear(k, fan_in, fan_out):
        kw, kb = jax.random.split(k)
        bound = 1.0 / jnp.sqrt(jnp.float32(fan_in))
        w = jax.random.uniform(kw, (fan_in, fan_out), jnp.float32, -bound, bound)
        b = jax.random.uniform(kb, (fan_out,), jnp.float32, -bound, bound)
        return w, b

    keys = jax.random.split(key, 6)
    return {
        "lH1": linear(keys[0], D_IN, H1),
        "lH2": linear(keys[1], H1, H2),
        "lH3": linear(keys[2], H2, H3),
        "lPi": linear(keys[3], H3, K),
        "lMu": linear(keys[4], H3, K * 1),
        "lSigSq": linear(keys[5], H3, K),
    }


def gauss_nn_mle_ref(x, params):
    """Pure-JAX (f32) reference of the PyTorch forward."""
    def lin(h, name):
        w, b = params[name]
        return h @ w + b

    h = jnp.tanh(lin(x, "lH1"))
    h = jnp.tanh(lin(h, "lH2"))
    z = jnp.tanh(lin(h, "lH3"))
    pi = jax.nn.softmax(lin(z, "lPi"), axis=1)
    sig_sq = jnp.exp(lin(z, "lSigSq"))
    mu = lin(z, "lMu")
    return pi, mu, sig_sq


if __name__ == "__main__":
    key = jax.random.PRNGKey(0)
    k_param, k_x = jax.random.split(key)

    params = init_params(k_param)
    x = jax.random.normal(k_x, (8, 1), jnp.float32)   # batch=8, in_features=1

    pi_r, mu_r, sig_r = gauss_nn_mle_ref(x, params)

    # f32 path (matmul + elementwise in f32): tight check vs the reference.
    pi, mu, sg = gauss_nn_mle_pallas(x, params, matmul_dtype=jnp.float32)
    jax.block_until_ready((pi, mu, sg))
    assert pi.shape == (8, K) and mu.shape == (8, K) and sg.shape == (8, K)
    assert jnp.allclose(pi, pi_r, atol=1e-4, rtol=1e-4)
    assert jnp.allclose(mu, mu_r, atol=1e-4, rtol=1e-4)
    assert jnp.allclose(sg, sig_r, atol=1e-4, rtol=1e-4)
    assert jnp.allclose(jnp.sum(pi, axis=1), 1.0, atol=1e-5)

    # bf16 fast path (bf16 MXU + bf16 tanh, f32 accumulation & epilogue).
    pi_b, mu_b, sg_b = gauss_nn_mle_pallas(x, params)
    jax.block_until_ready((pi_b, mu_b, sg_b))
    assert pi_b.shape == (8, K) and mu_b.shape == (8, K) and sg_b.shape == (8, K)
    assert jnp.allclose(pi_b, pi_r, atol=5e-2, rtol=5e-2)
    assert jnp.allclose(mu_b, mu_r, atol=5e-2, rtol=5e-2)
    assert jnp.allclose(sg_b, sig_r, atol=5e-2, rtol=5e-2)
    assert jnp.allclose(jnp.sum(pi_b, axis=1), 1.0, atol=1e-4)

    print("KERNEL_OK")
</pallas_src>

<mosaic_0001>
module attributes {stable_mosaic.version = 11 : i64} {
  func.func @_mdn_kernel(%arg0: i32, %arg1: memref<1x128xf32, #tpu.memory_space<vmem>>, %arg2: memref<128x8xf32, #tpu.memory_space<vmem>>, %arg3: memref<128x128xf32, #tpu.memory_space<vmem>>, %arg4: memref<128x128xf32, #tpu.memory_space<vmem>>, %arg5: memref<16x128xf32, #tpu.memory_space<vmem>>, %arg6: memref<16x128xf32, #tpu.memory_space<vmem>>) attributes {dimension_semantics = [#tpu.dimension_semantics<parallel>], iteration_bounds = array<i64: 1>, scalar_prefetch = 0 : i64, scratch_operands = 0 : i64, tpu.core_type = #tpu.core_type<tc>, window_params = [{transform_indices = @transform_0, window_bounds = array<i64: 1, 128>}, {pipeline_mode = #tpu.pipeline_mode<synchronous>, transform_indices = @transform_1, window_bounds = array<i64: 128, 8>}, {pipeline_mode = #tpu.pipeline_mode<synchronous>, transform_indices = @transform_2, window_bounds = array<i64: 128, 128>}, {pipeline_mode = #tpu.pipeline_mode<synchronous>, transform_indices = @transform_3, window_bounds = array<i64: 128, 128>}, {pipeline_mode = #tpu.pipeline_mode<synchronous>, transform_indices = @transform_4, window_bounds = array<i64: 16, 128>}, {transform_indices = @transform_5, window_bounds = array<i64: 16, 128>}]} {
    %c0 = arith.constant 0 : index
    %c0_0 = arith.constant 0 : index
    %0 = vector.load %arg2[%c0, %c0_0] : memref<128x8xf32, #tpu.memory_space<vmem>>, vector<128x8xf32>
    %1 = vector.extract_strided_slice %0 {offsets = [0, 0], sizes = [128, 1], strides = [1, 1]} : vector<128x8xf32> to vector<128x1xf32>
    %2 = vector.extract_strided_slice %0 {offsets = [0, 1], sizes = [128, 1], strides = [1, 1]} : vector<128x8xf32> to vector<128x1xf32>
    %3 = vector.extract_strided_slice %0 {offsets = [0, 2], sizes = [128, 1], strides = [1, 1]} : vector<128x8xf32> to vector<128x1xf32>
    %4 = vector.extract_strided_slice %0 {offsets = [0, 3], sizes = [128, 1], strides = [1, 1]} : vector<128x8xf32> to vector<128x1xf32>
    %5 = vector.extract_strided_slice %0 {offsets = [0, 4], sizes = [16, 1], strides = [1, 1]} : vector<128x8xf32> to vector<16x1xf32>
    %6 = vector.extract_strided_slice %0 {offsets = [0, 5], sizes = [16, 1], strides = [1, 1]} : vector<128x8xf32> to vector<16x1xf32>
    %cst = arith.constant 5.000000e-01 : f32
    %7 = vector.broadcast %cst : f32 to vector<16x1xf32>
    %8 = arith.cmpf ogt, %6, %7 : vector<16x1xf32>
    %9 = vector.extract_strided_slice %0 {offsets = [0, 6], sizes = [16, 1], strides = [1, 1]} : vector<128x8xf32> to vector<16x1xf32>
    %cst_1 = arith.constant 5.000000e-01 : f32
    %10 = vector.broadcast %cst_1 : f32 to vector<16x1xf32>
    %11 = arith.cmpf ogt, %9, %10 : vector<16x1xf32>
    %c0_2 = arith.constant 0 : index
    %c0_3 = arith.constant 0 : index
    %12 = vector.load %arg1[%c0_2, %c0_3] : memref<1x128xf32, #tpu.memory_space<vmem>>, vector<1x128xf32>
    %13 = vector.broadcast %1 : vector<128x1xf32> to vector<128x128xf32>
    %14 = vector.broadcast %12 : vector<1x128xf32> to vector<128x128xf32>
    %15 = arith.mulf %13, %14 : vector<128x128xf32>
    %16 = vector.broadcast %2 : vector<128x1xf32> to vector<128x128xf32>
    %17 = arith.addf %15, %16 : vector<128x128xf32>
    %18 = math.tanh %17 : vector<128x128xf32>
    %c0_4 = arith.constant 0 : index
    %c0_5 = arith.constant 0 : index
    %19 = vector.load %arg3[%c0_4, %c0_5] : memref<128x128xf32, #tpu.memory_space<vmem>>, vector<128x128xf32>
    %cst_6 = arith.constant dense<0.000000e+00> : vector<128x128xf32>
    %20 = tpu.matmul %19, %18, %cst_6 {dimension_numbers = #tpu.dot_dimension_numbers<[1], [0], [0], [1], [0, 0, 1, 1], [], []>} : vector<128x128xf32>, vector<128x128xf32>, vector<128x128xf32> -> vector<128x128xf32>
    %21 = vector.broadcast %3 : vector<128x1xf32> to vector<128x128xf32>
    %22 = arith.addf %20, %21 : vector<128x128xf32>
    %23 = math.tanh %22 : vector<128x128xf32>
    %c0_7 = arith.constant 0 : index
    %c0_8 = arith.constant 0 : index
    %24 = vector.load %arg4[%c0_7, %c0_8] : memref<128x128xf32, #tpu.memory_space<vmem>>, vector<128x128xf32>
    %cst_9 = arith.constant dense<0.000000e+00> : vector<128x128xf32>
    %25 = tpu.matmul %24, %23, %cst_9 {dimension_numbers = #tpu.dot_dimension_numbers<[1], [0], [0], [1], [0, 0, 1, 1], [], []>} : vector<128x128xf32>, vector<128x128xf32>, vector<128x128xf32> -> vector<128x128xf32>
    %26 = vector.broadcast %4 : vector<128x1xf32> to vector<128x128xf32>
    %27 = arith.addf %25, %26 : vector<128x128xf32>
    %28 = math.tanh %27 : vector<128x128xf32>
    %c0_10 = arith.constant 0 : index
    %c0_11 = arith.constant 0 : index
    %29 = vector.load %arg5[%c0_10, %c0_11] : memref<16x128xf32, #tpu.memory_space<vmem>>, vector<16x128xf32>
    %cst_12 = arith.constant dense<0.000000e+00> : vector<16x128xf32>
    %30 = tpu.matmul %29, %28, %cst_12 {dimension_numbers = #tpu.dot_dimension_numbers<[1], [0], [0], [1], [0, 0, 1, 1], [], []>} : vector<16x128xf32>, vector<128x128xf32>, vector<16x128xf32> -> vector<16x128xf32>
    %31 = vector.broadcast %5 : vector<16x1xf32> to vector<16x128xf32>
    %32 = arith.addf %30, %31 : vector<16x128xf32>
    %33 = math.exp %32 : vector<16x128xf32>
    %cst_13 = arith.constant 0.000000e+00 : f32
    %34 = vector.shape_cast %8 : vector<16x1xi1> to vector<16x1xi1>
    %35 = vector.broadcast %34 : vector<16x1xi1> to vector<16x128xi1>
    %36 = vector.broadcast %cst_13 : f32 to vector<16x128xf32>
    %37 = arith.select %35, %33, %36 : vector<16x128xi1>, vector<16x128xf32>
    %cst_14 = arith.constant dense<0.000000e+00> : vector<128xf32>
    %38 = vector.multi_reduction <add>, %37, %cst_14 [0] : vector<16x128xf32> to vector<128xf32>
    %39 = vector.shape_cast %38 : vector<128xf32> to vector<1x128xf32>
    %40 = tpu.reciprocal %39 : vector<1x128xf32> -> vector<1x128xf32>
    %41 = vector.broadcast %40 : vector<1x128xf32> to vector<16x128xf32>
    %42 = arith.mulf %33, %41 : vector<16x128xf32>
    %43 = vector.shape_cast %11 : vector<16x1xi1> to vector<16x1xi1>
    %44 = vector.broadcast %43 : vector<16x1xi1> to vector<16x128xi1>
    %45 = arith.select %44, %32, %33 : vector<16x128xi1>, vector<16x128xf32>
    %46 = vector.shape_cast %8 : vector<16x1xi1> to vector<16x1xi1>
    %47 = vector.broadcast %46 : vector<16x1xi1> to vector<16x128xi1>
    %48 = arith.select %47, %42, %45 : vector<16x128xi1>, vector<16x128xf32>
    %c0_15 = arith.constant 0 : index
    %c0_16 = arith.constant 0 : index
    %49 = vector.load %arg6[%c0_15, %c0_16] : memref<16x128xf32, #tpu.memory_space<vmem>>, vector<16x128xf32>
    tpu.vector_store %arg6[%c0_15, %c0_16], %48 {strides = array<i32>} : memref<16x128xf32, #tpu.memory_space<vmem>>, vector<16x128xf32>,
    return
  }
  func.func @transform_0(%arg0: i32) -> (i32, i32) {
    %c0_i32 = arith.constant 0 : i32
    %c0_i32_0 = arith.constant 0 : i32
    return %c0_i32, %arg0 : i32, i32
  }
  func.func @transform_1(%arg0: i32) -> (i32, i32) {
    %c0_i32 = arith.constant 0 : i32
    %c0_i32_0 = arith.constant 0 : i32
    %c0_i32_1 = arith.constant 0 : i32
    return %c0_i32, %c0_i32_0 : i32, i32
  }
  func.func @transform_2(%arg0: i32) -> (i32, i32) {
    %c0_i32 = arith.constant 0 : i32
    %c0_i32_0 = arith.constant 0 : i32
    %c0_i32_1 = arith.constant 0 : i32
    return %c0_i32, %c0_i32_0 : i32, i32
  }
  func.func @transform_3(%arg0: i32) -> (i32, i32) {
    %c0_i32 = arith.constant 0 : i32
    %c0_i32_0 = arith.constant 0 : i32
    %c0_i32_1 = arith.constant 0 : i32
    return %c0_i32, %c0_i32_0 : i32, i32
  }
  func.func @transform_4(%arg0: i32) -> (i32, i32) {
    %c0_i32 = arith.constant 0 : i32
    %c0_i32_0 = arith.constant 0 : i32
    %c0_i32_1 = arith.constant 0 : i32
    return %c0_i32, %c0_i32_0 : i32, i32
  }
  func.func @transform_5(%arg0: i32) -> (i32, i32) {
    %c0_i32 = arith.constant 0 : i32
    %c0_i32_0 = arith.constant 0 : i32
    return %c0_i32, %arg0 : i32, i32
  }
}

</mosaic_0001>

<bundles_post_ra>
// kernel: tpu_custom_call.1
= control target key start
LH: loop header
LB: loop body
LE: loop exit
PB: predicated region body
PF: predicated region fallthrough
CT: control target
= control target key end

     0   :  { %10 = vsyncpa [#allocation3], 0  ;;  %s1711_s0 = inlined_call_operand.vmem [shape: f32[1,128], index: 0, kind: input, shape index: {}]   ;;  %s1712_s1 = inlined_call_operand.vmem [shape: f32[128,8], index: 1, kind: input, shape index: {}]   ;;  %s1713_s2 = inlined_call_operand.vmem [shape: f32[128,128], index: 2, kind: input, shape index: {}]   ;;  %s1714_s3 = inlined_call_operand.hbm [shape: f32[128,128], index: 3, kind: input, shape index: {}]   ;;  %s1715_s4 = inlined_call_operand.vmem [shape: f32[16,128], index: 4, kind: input, shape index: {}]   ;;  %s1716_s5 = inlined_call_operand.hbm [shape: f32[16,128], index: 5, kind: output, shape index: {}]  }
   0x1   :  { %11 = vsyncpa [#allocation4], 0  ;;  %s1390_s18 = smov [#allocation2]   ;;  %s1342_s22 = scalar_lea.hbm %s1714_s3, 2048 }
   0x2   :  { %s23_s19 = sshll.u32 %s1390_s18, 4  ;;  %p1343_p0 = scmp.ne.s32.totalorder %s1714_s3, %s1342_s22  ;;  %s24_s19 = int_to_ptr.vmem [resolvable:$true] %s23_s19 }
   0x3   :  { %p1346_p1 = scmp.lt.u32.totalorder %s1342_s22, %s1714_s3 }
   0x5   :  { %p1348_p2 = pnand %p1346_p1, %p1343_p0 }
   0x7   :  { %1351 = shalt.err (!%p1348_p2)
}
   0x8   :  { %s1352_s27 = scalar_lea.vmem %s24_s19, 2048  ;;  %p1357_p4 = scmp.lt.s32.totalorder %s24_s19, %s24_s19 }
   0x9   :  { %p1353_p3 = scmp.ne.s32.totalorder %s24_s19, %s1352_s27  ;;  %p1358_p5 = scmp.lt.s32.totalorder %s1352_s27, %s1352_s27 }
   0xb   :  { %p1359_p6 = por %p1358_p5, %p1357_p4 }
   0xd   :  { %p1360_p7 = pnand %p1359_p6, %p1353_p3 }
   0xf   :  { %1363 = shalt.err (!%p1360_p7)
}
  0x10   :  { %s1391_s28 = smov 128   ;;  %s1392_s29 = smov 8  }
  0x11   :  { %29 = dma.hbm_to_vmem [thread:$0]  %s1714_s3, 2048, %s24_s19, [#allocation3], %s1391_s28, %s1391_s28, %s1392_s29  }
  0x12   :  { %1386 = dma.done.wait [#allocation3], 2048  }
  0x13   :  { %1387 = vsyncadd [#allocation3], 4294965248  ;;  %v1393_v0 = vmov 1   ;;  %v1451_v1 = vld [vmem:[%s1712_s1 + $0x10] sm:$0xff]  ;;  %v1456_v2 = vld [vmem:[%s1712_s1] sm:$0xff]  ;;  %v1394_v7 = vmov 0  }
  0x14   :  { %1215 = vset.pattern.permute.xlu0 %v1393_v0  ;;  %1213 = vset.pattern.permute.xlu1 %v1393_v0  ;;  %v1463_v3 = vld [vmem:[%s1712_s1 + $0x30] sm:$0xff]  ;;  %v1468_v4 = vld [vmem:[%s1712_s1 + $0x8] sm:$0xff]  ;;  %v1480_v6 = vld [vmem:[%s1712_s1 + $0x18] sm:$0xff]  ;;  %v1395_v23 = vmov 2   ;;  %vm51_vm0 = vcmp.gt.f32.partialorder %v1456_v2, 0.5 }
  0x15   :  { %165 = vperm.xlu0 %1215, %v1451_v1   ;;  %157 = vperm.xlu1 %1213, %v1456_v2   ;;  %v1475_v5 = vld [vmem:[%s1712_s1 + $0x50] sm:$0xff]  ;;  %v1492_v8 = vld [vmem:[%s1712_s1 + $0x20] sm:$0xff]  ;;  %v1501_v9 = vld [vmem:[%s1712_s1 + $0x28] sm:$0xff]  ;;  %vm52_vm1 = vcmp.gt.f32.partialorder %v1468_v4, 0.5 }
  0x16   :  { %v1511_v10 = vld [vmem:[%s1712_s1 + $0x48] sm:$0xff]  ;;  %v1516_v11 = vld [vmem:[%s1712_s1 + $0x38] sm:$0xff]  ;;  %v1532_v13 = vld [vmem:[%s1712_s1 + $0x40] sm:$0xff] }
  0x17   :  { %v1527_v12 = vld [vmem:[%s1712_s1 + $0x68] sm:$0xff]  ;;  %v1539_v14 = vld [vmem:[%s1712_s1 + $0x70] sm:$0xff]  ;;  %v1551_v15 = vld [vmem:[%s1712_s1 + $0x58] sm:$0xff] }
  0x18   :  { %v1560_v16 = vld [vmem:[%s1712_s1 + $0x60] sm:$0xff]  ;;  %v1570_v17 = vld [vmem:[%s1712_s1 + $0x78] sm:$0xff] }
  0x19   :  { %181 = vperm.xlu0 %1215, %v1463_v3   ;;  %161 = vperm.xlu1 %1213, %v1468_v4   ;;  %v252_v18 = vld [vmem:[%s1713_s2] sm:$0xff] }
  0x1a   :  { %991 = vmatprep.mubr.f32.mxu0 %v252_v18  ;;  %v1588_v26 = vld [vmem:[%s1711_s0] ss:$0 sm:$0xff] }
  0x1d   :  { %197 = vperm.xlu0 %1215, %v1475_v5   ;;  %1214 = vset.pattern.permute.xlu1 %v1394_v7 }
  0x1e   :  { %71 = vperm.xlu1 %1214, %v1480_v6  }
  0x21   :  { %1224 = vset.pattern.permute.xlu0 %v1394_v7 }
  0x22   :  { %56 = vperm.xlu0 %1224, %v1456_v2   ;;  %1216 = vset.pattern.permute.xlu1 %v1393_v0 }
  0x23   :  { %169 = vperm.xlu1 %1216, %v1480_v6  }
  0x26   :  { %61 = vperm.xlu0 %1224, %v1468_v4  }
  0x27   :  { %1217 = vset.pattern.permute.xlu1 %v1394_v7 }
  0x28   :  { %76 = vperm.xlu1 %1217, %v1492_v8  }
  0x2a   :  { %66 = vperm.xlu0 %1224, %v1451_v1  }
  0x2c   :  { %1218 = vset.pattern.permute.xlu1 %v1393_v0 }
  0x2d   :  { %173 = vperm.xlu1 %1218, %v1492_v8  }
  0x2e   :  { %81 = vperm.xlu0 %1224, %v1501_v9  }
  0x31   :  { %177 = vperm.xlu1 %1218, %v1501_v9  }
  0x32   :  { %86 = vperm.xlu0 %1224, %v1463_v3  }
  0x35   :  { %1219 = vset.pattern.permute.xlu1 %v1394_v7 }
  0x36   :  { %101 = vperm.xlu0 %1224, %v1511_v10   ;;  %91 = vperm.xlu1 %1219, %v1516_v11  }
  0x3a   :  { %106 = vperm.xlu0 %1224, %v1475_v5   ;;  %1220 = vset.pattern.permute.xlu1 %v1393_v0 }
  0x3b   :  { %185 = vperm.xlu1 %1220, %v1516_v11  }
  0x3e   :  { %121 = vperm.xlu0 %1224, %v1527_v12  }
  0x3f   :  { %1221 = vset.pattern.permute.xlu1 %v1394_v7 }
  0x40   :  { %96 = vperm.xlu1 %1221, %v1532_v13  }
  0x42   :  { %126 = vperm.xlu0 %1224, %v1539_v14  }
  0x44   :  { %1222 = vset.pattern.permute.xlu1 %v1393_v0 }
  0x45   :  { %189 = vperm.xlu1 %1222, %v1532_v13  }
  0x46   :  { %1229 = vset.pattern.permute.xlu0 %v1393_v0 }
  0x47   :  { %213 = vperm.xlu0 %1229, %v1539_v14  }
  0x49   :  { %193 = vperm.xlu1 %1222, %v1511_v10  }
  0x4b   :  { %1232 = vset.pattern.permute.xlu0 %v1395_v23 }
  0x4c   :  { %273 = vperm.xlu0 %1232, %v1468_v4  }
  0x4d   :  { %1223 = vset.pattern.permute.xlu1 %v1394_v7 }
  0x4e   :  { %111 = vperm.xlu1 %1223, %v1551_v15  }
  0x50   :  { %285 = vperm.xlu0 %1232, %v1492_v8  }
  0x52   :  { %1225 = vset.pattern.permute.xlu1 %v1393_v0 }
  0x53   :  { %201 = vperm.xlu1 %1225, %v1551_v15  }
  0x54   :  { %293 = vperm.xlu0 %1232, %v1463_v3  }
  0x57   :  { %1226 = vset.pattern.permute.xlu1 %v1394_v7 }
  0x58   :  { %116 = vperm.xlu1 %1226, %v1560_v16   ;;  %301 = vperm.xlu0 %1232, %v1532_v13  }
  0x5c   :  { %1227 = vset.pattern.permute.xlu1 %v1393_v0  ;;  %309 = vperm.xlu0 %1232, %v1475_v5  }
  0x5d   :  { %205 = vperm.xlu1 %1227, %v1560_v16  }
  0x60   :  { %317 = vperm.xlu0 %1232, %v1560_v16  }
  0x61   :  { %209 = vperm.xlu1 %1227, %v1527_v12  }
  0x64   :  { %325 = vperm.xlu0 %1232, %v1539_v14  }
  0x65   :  { %1228 = vset.pattern.permute.xlu1 %v1394_v7 }
  0x66   :  { %131 = vperm.xlu1 %1228, %v1570_v17  }
  0x6a   :  { %1230 = vset.pattern.permute.xlu1 %v1393_v0 }
  0x6b   :  { %217 = vperm.xlu1 %1230, %v1570_v17  }
  0x6f   :  { %1231 = vset.pattern.permute.xlu1 %v1395_v23 }
  0x70   :  { %269 = vperm.xlu1 %1231, %v1456_v2  }
  0x74   :  { %277 = vperm.xlu1 %1231, %v1451_v1  }
  0x78   :  { %281 = vperm.xlu1 %1231, %v1480_v6  }
  0x7c   :  { %289 = vperm.xlu1 %1231, %v1501_v9  }
  0x80   :  { %297 = vperm.xlu1 %1231, %v1516_v11  }
  0x84   :  { %305 = vperm.xlu1 %1231, %v1511_v10  }
  0x88   :  { %313 = vperm.xlu1 %1231, %v1551_v15  }
  0x8c   :  { %321 = vperm.xlu1 %1231, %v1527_v12  }
  0x90   :  { %329 = vperm.xlu1 %1231, %v1570_v17  }
  0x94   :  { %v158_v19 = vpop.permute.xlu1 %157  ;;  %v166_v20 = vpop.permute.xlu0 %165 }
  0x98   :  { %v162_v21 = vpop.permute.xlu1 %161  ;;  %v182_v22 = vpop.permute.xlu0 %181 }
  0x9c   :  { %v1579_v24 = vpop.permute.xlu0 %197 }
  0x9d   :  { %v72_v25 = vpop.permute.xlu1 %71 }
  0x9e   :  { %v143_v33 = vmul.f32 %v1588_v26, %v72_v25 }
  0xa1   :  { %v57_v27 = vpop.permute.xlu0 %56 }
  0xa2   :  { %v140_v28 = vmul.f32 %v1588_v26, %v57_v27  ;;  %v170_v29 = vpop.permute.xlu1 %169 }
  0xa3   :  { %v223_v36 = vadd.f32 %v170_v29, %v143_v33 }
  0xa4   :  { %v220_v30 = vadd.f32 %v158_v19, %v140_v28 }
  0xa5   :  { %v62_v31 = vpop.permute.xlu0 %61 }
  0xa6   :  { %v141_v32 = vmul.f32 %v1588_v26, %v62_v31  ;;  %1240 = vtanh.f32 %v220_v30 }
  0xa7   :  { %v77_v34 = vpop.permute.xlu1 %76 }
  0xa8   :  { %v221_v35 = vadd.f32 %v162_v21, %v141_v32  ;;  %v144_v39 = vmul.f32 %v1588_v26, %v77_v34 }
  0xa9   :  { %v67_v37 = vpop.permute.xlu0 %66 }
  0xaa   :  { %1242 = vtanh.f32 %v221_v35  ;;  %v142_v38 = vmul.f32 %v1588_v26, %v67_v37 }
  0xab   :  { %1244 = vtanh.f32 %v223_v36 }
  0xac   :  { %v222_v40 = vadd.f32 %v166_v20, %v142_v38  ;;  %v174_v41 = vpop.permute.xlu1 %173 }
  0xad   :  { %v82_v42 = vpop.permute.xlu0 %81  ;;  %v224_v43 = vadd.f32 %v174_v41, %v144_v39 }
  0xae   :  { %1246 = vtanh.f32 %v222_v40  ;;  %v145_v44 = vmul.f32 %v1588_v26, %v82_v42 }
  0xaf   :  { %1248 = vtanh.f32 %v224_v43 }
  0xb0   :  { %v178_v45 = vpop.permute.xlu1 %177  ;;  %v1241_v47 = vpop.eup %1240 }
  0xb1   :  { %v225_v46 = vadd.f32 %v178_v45, %v145_v44  ;;  %v87_v48 = vpop.permute.xlu0 %86 }
  0xb2   :  { %v146_v50 = vmul.f32 %v1588_v26, %v87_v48 }
  0xb3   :  { %1250 = vtanh.f32 %v225_v46 }
  0xb4   :  { %v1243_v49 = vpop.eup %1242  ;;  %v226_v55 = vadd.f32 %v182_v22, %v146_v50 }
  0xb5   :  { %v92_v51 = vpop.permute.xlu1 %91  ;;  %v1106_v52 = vpack.c.bf16 %v1243_v49, %v1241_v47  ;;  %v1245_v53 = vpop.eup %1244 }
  0xb6   :  { %v147_v56 = vmul.f32 %v1588_v26, %v92_v51  ;;  %1252 = vtanh.f32 %v226_v55  ;;  %v102_v0 = vpop.permute.xlu0 %101 }
  0xb7   :  { %1107 = vmatprep.subr.bf16.mxu0 %v1106_v52  ;;  %v149_v20 = vmul.f32 %v1588_v26, %v102_v0  ;;  %v255_v0 = vld [vmem:[%s1713_s2 + $0x18] sm:$0xff] }
  0xb8   :  { %v1247_v54 = vpop.eup %1246  ;;  %1109 = vmatpush3.bf16.msra.mxu0 %v1106_v52 }
  0xb9   :  { %v1110_v57 = vpack.c.bf16 %v1245_v53, %v1247_v54  ;;  %v1249_v60 = vpop.eup %1248 }
  0xba   :  { %v186_v58 = vpop.permute.xlu1 %185  ;;  %v107_v28 = vpop.permute.xlu0 %106 }
  0xbb   :  { %v227_v59 = vadd.f32 %v186_v58, %v147_v56  ;;  %1111 = vmatprep.subr.bf16.mxu0 %v1110_v57  ;;  %v150_v30 = vmul.f32 %v1588_v26, %v107_v28  ;;  %v264_v28 = vld [vmem:[%s1713_s2 + $0x60] sm:$0xff] }
  0xbc   :  { %1113 = vmatpush3.bf16.msra.mxu0 %v1110_v57 }
  0xbd   :  { %v1251_v61 = vpop.eup %1250  ;;  %1254 = vtanh.f32 %v227_v59  ;;  %v230_v32 = vadd.f32 %v1579_v24, %v150_v30  ;;  %v266_v30 = vld [vmem:[%s1713_s2 + $0x70] sm:$0xff] }
  0xbe   :  { %v1114_v62 = vpack.c.bf16 %v1251_v61, %v1249_v60  ;;  %v122_v40 = vpop.permute.xlu0 %121 }
  0xbf   :  { %v97_v63 = vpop.permute.xlu1 %96  ;;  %v153_v24 = vmul.f32 %v1588_v26, %v122_v40 }
  0xc0   :  { %1115 = vmatprep.subr.bf16.mxu0 %v1114_v62  ;;  %v148_v18 = vmul.f32 %v1588_v26, %v97_v63  ;;  %v1253_v21 = vpop.eup %1252  ;;  %v253_v63 = vld [vmem:[%s1713_s2 + $0x8] sm:$0xff] }
  0xc1   :  { %1117 = vmatpush3.bf16.msra.mxu0 %v1114_v62 }
  0xc2   :  { %v127_v46 = vpop.permute.xlu0 %126 }
  0xc3   :  { %v154_v50 = vmul.f32 %v1588_v26, %v127_v46 }
  0xc4   :  { %v190_v19 = vpop.permute.xlu1 %189 }
  0xc5   :  { %v228_v22 = vadd.f32 %v190_v19, %v148_v18  ;;  %v256_v18 = vld [vmem:[%s1713_s2 + $0x20] sm:$0xff]  ;;  %v257_v19 = vld [vmem:[%s1713_s2 + $0x28] sm:$0xff] }
  0xc6   :  { %v214_v51 = vpop.permute.xlu0 %213 }
  0xc7   :  { %v1255_v23 = vpop.eup %1254  ;;  %1256 = vtanh.f32 %v228_v22  ;;  %v234_v53 = vadd.f32 %v214_v51, %v154_v50  ;;  %v260_v22 = vld [vmem:[%s1713_s2 + $0x40] sm:$0xff] }
  0xc8   :  { %v194_v25 = vpop.permute.xlu1 %193  ;;  %v1118_v27 = vpack.c.bf16 %v1255_v23, %v1253_v21  ;;  %v259_v21 = vld [vmem:[%s1713_s2 + $0x38] sm:$0xff]  ;;  %v261_v23 = vld [vmem:[%s1713_s2 + $0x48] sm:$0xff] }
  0xc9   :  { %v229_v29 = vadd.f32 %v194_v25, %v149_v20  ;;  %v258_v20 = vld [vmem:[%s1713_s2 + $0x30] sm:$0xff] }
  0xca   :  { %1119 = vmatprep.subr.bf16.mxu0 %v1118_v27  ;;  %v262_v25 = vld [vmem:[%s1713_s2 + $0x50] sm:$0xff] }
  0xcb   :  { %1258 = vtanh.f32 %v229_v29  ;;  %1121 = vmatpush3.bf16.msra.mxu0 %v1118_v27  ;;  %v263_v27 = vld [vmem:[%s1713_s2 + $0x58] sm:$0xff]  ;;  %v265_v29 = vld [vmem:[%s1713_s2 + $0x68] sm:$0xff] }
  0xcc   :  { %1260 = vtanh.f32 %v230_v32  ;;  %v493_v32 = vld [vmem:[#allocation2] sm:$0xff] }
  0xcd   :  { %v112_v31 = vpop.permute.xlu1 %111  ;;  %1047 = vmatprep.mubr.f32.mxu1 %v493_v32 }
  0xce   :  { %v151_v33 = vmul.f32 %v1588_v26, %v112_v31  ;;  %v267_v31 = vld [vmem:[%s1713_s2 + $0x78] sm:$0xff] }
  0xd1   :  { %v1257_v36 = vpop.eup %1256 }
  0xd2   :  { %v202_v34 = vpop.permute.xlu1 %201 }
  0xd3   :  { %v231_v35 = vadd.f32 %v202_v34, %v151_v33  ;;  %v1396_v33 = vmov 3  }
  0xd4   :  { %1233 = vset.pattern.permute.xlu0 %v1396_v33  ;;  %1234 = vset.pattern.permute.xlu1 %v1396_v33 }
  0xd5   :  { %v1259_v37 = vpop.eup %1258  ;;  %1262 = vtanh.f32 %v231_v35  ;;  %510 = vperm.xlu0 %1233, %v1456_v2   ;;  %514 = vperm.xlu1 %1234, %v1468_v4  }
  0xd6   :  { %v1122_v38 = vpack.c.bf16 %v1259_v37, %v1257_v36  ;;  %v1261_v43 = vpop.eup %1260 }
  0xd7   :  { %v117_v39 = vpop.permute.xlu1 %116 }
  0xd8   :  { %1123 = vmatprep.subr.bf16.mxu0 %v1122_v38  ;;  %v152_v41 = vmul.f32 %v1588_v26, %v117_v39 }
  0xd9   :  { %1125 = vmatpush3.bf16.msra.mxu0 %v1122_v38  ;;  %522 = vperm.xlu0 %1233, %v1480_v6  }
  0xda   :  { %518 = vperm.xlu1 %1234, %v1451_v1  }
  0xdc   :  { %v206_v42 = vpop.permute.xlu1 %205 }
  0xdd   :  { %v232_v44 = vadd.f32 %v206_v42, %v152_v41  ;;  %530 = vperm.xlu0 %1233, %v1501_v9  }
  0xde   :  { %526 = vperm.xlu1 %1234, %v1492_v8  }
  0xdf   :  { %v1263_v45 = vpop.eup %1262  ;;  %1264 = vtanh.f32 %v232_v44 }
  0xe0   :  { %v210_v47 = vpop.permute.xlu1 %209  ;;  %v1126_v48 = vpack.c.bf16 %v1263_v45, %v1261_v43 }
  0xe1   :  { %v233_v49 = vadd.f32 %v210_v47, %v153_v24  ;;  %538 = vperm.xlu0 %1233, %v1516_v11  }
  0xe2   :  { %1127 = vmatprep.subr.bf16.mxu0 %v1126_v48  ;;  %534 = vperm.xlu1 %1234, %v1463_v3   ;;  %v274_v3 = vpop.permute.xlu0 %273 }
  0xe3   :  { %1266 = vtanh.f32 %v233_v49  ;;  %1129 = vmatpush3.bf16.msra.mxu0 %v1126_v48 }
  0xe4   :  { %1268 = vtanh.f32 %v234_v53 }
  0xe5   :  { %v132_v52 = vpop.permute.xlu1 %131  ;;  %546 = vperm.xlu0 %1233, %v1511_v10  }
  0xe6   :  { %v155_v54 = vmul.f32 %v1588_v26, %v132_v52  ;;  %v254_v26 = vld [vmem:[%s1713_s2 + $0x10] sm:$0xff]  ;;  %542 = vperm.xlu1 %1234, %v1532_v13   ;;  %v286_v10 = vpop.permute.xlu0 %285 }
  0xe9   :  { %v1265_v57 = vpop.eup %1264  ;;  %554 = vperm.xlu0 %1233, %v1551_v15  }
  0xea   :  { %v218_v55 = vpop.permute.xlu1 %217  ;;  %550 = vperm.xlu1 %1234, %v1475_v5   ;;  %v294_v35 = vpop.permute.xlu0 %293 }
  0xeb   :  { %v235_v56 = vadd.f32 %v218_v55, %v155_v54 }
  0xed   :  { %v1267_v58 = vpop.eup %1266  ;;  %1270 = vtanh.f32 %v235_v56  ;;  %562 = vperm.xlu0 %1233, %v1527_v12  }
  0xee   :  { %v1130_v59 = vpack.c.bf16 %v1267_v58, %v1265_v57  ;;  %v1269_v60 = vpop.eup %1268  ;;  %558 = vperm.xlu1 %1234, %v1560_v16   ;;  %v302_v41 = vpop.permute.xlu0 %301 }
  0xef   :  { %v270_v1 = vpop.permute.xlu1 %269 }
  0xf0   :  { %1131 = vmatprep.subr.bf16.mxu0 %v1130_v59 }
  0xf1   :  { %1133 = vmatpush3.bf16.msra.mxu0 %v1130_v59  ;;  %570 = vperm.xlu0 %1233, %v1570_v17  }
  0xf2   :  { %566 = vperm.xlu1 %1234, %v1539_v14   ;;  %v310_v51 = vpop.permute.xlu0 %309 }
  0xf3   :  { %v278_v6 = vpop.permute.xlu1 %277 }
  0xf7   :  { %v1271_v61 = vpop.eup %1270  ;;  %v282_v8 = vpop.permute.xlu1 %281 }
  0xf8   :  { %v1134_v62 = vpack.c.bf16 %v1271_v61, %v1269_v60 }
  0xfa   :  { %1135 = vmatprep.subr.bf16.mxu0 %v1134_v62 }
  0xfb   :  { %1137 = vmatpush3.bf16.msra.mxu0 %v1134_v62  ;;  %v290_v9 = vpop.permute.xlu1 %289 }
  0xfe   :  { %992 = vmatmul.mubr.f32.vlgmr.msra.gmra.mrb[0].mxu0 %v253_v63 }
  0xff   :  { %994 = vmatprep.mubr.f32.mxu0 %v254_v26  ;;  %v298_v5 = vpop.permute.xlu1 %297  ;;  %v318_v26 = vpop.permute.xlu0 %317 }
 0x102   :  { %995 = vmatmul.mubr.f32.gmra.mrb[2].mxu0 %v255_v0 }
 0x103   :  { %997 = vmatprep.mubr.f32.mxu0 %v256_v18  ;;  %v306_v39 = vpop.permute.xlu1 %305 }
 0x106   :  { %998 = vmatmul.mubr.f32.gmra.mrb[4].mxu0 %v257_v19 }
 0x107   :  { %1000 = vmatprep.mubr.f32.mxu0 %v258_v20  ;;  %v314_v48 = vpop.permute.xlu1 %313 }
 0x10a   :  { %1001 = vmatmul.mubr.f32.gmra.mrb[6].mxu0 %v259_v21 }
 0x10b   :  { %1003 = vmatprep.mubr.f32.mxu0 %v260_v22  ;;  %v322_v62 = vpop.permute.xlu1 %321 }
 0x10e   :  { %1004 = vmatmul.mubr.f32.gmra.mrb[8].mxu0 %v261_v23 }
 0x10f   :  { %1006 = vmatprep.mubr.f32.mxu0 %v262_v25 }
 0x112   :  { %1007 = vmatmul.mubr.f32.gmra.mrb[10].mxu0 %v263_v27  ;;  %v330_v27 = vpop.permute.xlu1 %329 }
 0x113   :  { %1009 = vmatprep.mubr.f32.mxu0 %v264_v28 }
 0x116   :  { %1010 = vmatmul.mubr.f32.gmra.mrb[12].mxu0 %v265_v29 }
 0x117   :  { %1012 = vmatprep.mubr.f32.mxu0 %v266_v30  ;;  %v326_v30 = vpop.permute.xlu0 %325 }
 0x11a   :  { %1013 = vmatmul.mubr.f32.gmra.mrb[14].mxu0 %v267_v31 }
 0x1d1   :  { %v993_v11 = vpop.f32.mrb[0].mxu0 }
 0x1d2   :  { %v404_v13 = vadd.f32 %v993_v11, %v274_v3  ;;  %v398_v34 = vpop.f32.mrb[1].mxu0 }
 0x1d3   :  { %v399_v15 = vadd.f32 %v398_v34, %v270_v1 }
 0x1d4   :  { %1272 = vtanh.f32 %v404_v13 }
 0x1d5   :  { %1274 = vtanh.f32 %v399_v15  ;;  %v996_v12 = vpop.f32.mrb[2].mxu0 }
 0x1d6   :  { %v414_v16 = vadd.f32 %v996_v12, %v282_v8  ;;  %v408_v36 = vpop.f32.mrb[3].mxu0  ;;  %v494_v12 = vld [vmem:[#allocation2 + $0x8] sm:$0xff] }
 0x1d7   :  { %v409_v17 = vadd.f32 %v408_v36, %v278_v6  ;;  %v497_v36 = vld [vmem:[#allocation2 + $0x20] sm:$0xff] }
 0x1d8   :  { %1276 = vtanh.f32 %v414_v16  ;;  %v496_v16 = vld [vmem:[#allocation2 + $0x18] sm:$0xff] }
 0x1d9   :  { %1278 = vtanh.f32 %v409_v17  ;;  %v999_v14 = vpop.f32.mrb[4].mxu0  ;;  %v498_v17 = vld [vmem:[#allocation2 + $0x28] sm:$0xff] }
 0x1da   :  { %v424_v37 = vadd.f32 %v999_v14, %v290_v9  ;;  %v418_v38 = vpop.f32.mrb[5].mxu0  ;;  %v499_v14 = vld [vmem:[#allocation2 + $0x30] sm:$0xff] }
 0x1db   :  { %v419_v40 = vadd.f32 %v418_v38, %v286_v10  ;;  %v501_v38 = vld [vmem:[#allocation2 + $0x40] sm:$0xff] }
 0x1dc   :  { %1280 = vtanh.f32 %v424_v37  ;;  %v500_v37 = vld [vmem:[#allocation2 + $0x38] sm:$0xff] }
 0x1dd   :  { %1282 = vtanh.f32 %v419_v40  ;;  %v1002_v42 = vpop.f32.mrb[6].mxu0  ;;  %v503_v40 = vld [vmem:[#allocation2 + $0x50] sm:$0xff] }
 0x1de   :  { %v1273_v43 = vpop.eup %1272  ;;  %v434_v44 = vadd.f32 %v1002_v42, %v298_v5  ;;  %v428_v45 = vpop.f32.mrb[7].mxu0  ;;  %v505_v42 = vld [vmem:[#allocation2 + $0x60] sm:$0xff] }
 0x1df   :  { %v1275_v24 = vpop.eup %1274  ;;  %v429_v46 = vadd.f32 %v428_v45, %v294_v35  ;;  %v495_v35 = vld [vmem:[#allocation2 + $0x10] sm:$0xff]  ;;  %v508_v45 = vld [vmem:[#allocation2 + $0x78] sm:$0xff] }
 0x1e0   :  { %1284 = vtanh.f32 %v434_v44  ;;  %v1138_v47 = vpack.c.bf16 %v1273_v43, %v1275_v24  ;;  %v506_v43 = vld [vmem:[#allocation2 + $0x68] sm:$0xff]  ;;  %v507_v44 = vld [vmem:[#allocation2 + $0x70] sm:$0xff]  ;;  %v734_v24 = vld [vmem:[%s1715_s4] sm:$0xff] }
 0x1e1   :  { %1286 = vtanh.f32 %v429_v46  ;;  %v1005_v49 = vpop.f32.mrb[8].mxu0  ;;  %1103 = vmatprep.mubr.f32.mxu0 %v734_v24  ;;  %v1397_v46 = vmov 4  }
 0x1e2   :  { %v1277_v50 = vpop.eup %1276  ;;  %v444_v52 = vadd.f32 %v1005_v49, %v306_v39  ;;  %v438_v53 = vpop.f32.mrb[9].mxu0  ;;  %1139 = vmatprep.subr.bf16.mxu1 %v1138_v47  ;;  %v502_v39 = vld [vmem:[#allocation2 + $0x48] sm:$0xff]  ;;  %1236 = vset.pattern.permute.xlu0 %v1397_v46  ;;  %v1399_v49 = vmov 6  }
 0x1e3   :  { %v1279_v54 = vpop.eup %1278  ;;  %v439_v55 = vadd.f32 %v438_v53, %v302_v41  ;;  %1141 = vmatpush3.bf16.msra.mxu1 %v1138_v47  ;;  %v504_v41 = vld [vmem:[#allocation2 + $0x58] sm:$0xff]  ;;  %1235 = vset.pattern.permute.xlu1 %v1397_v46  ;;  %v823_v47 = vsel %vm51_vm0, 1, %v1394_v7 }
 0x1e4   :  { %1288 = vtanh.f32 %v444_v52  ;;  %v1142_v56 = vpack.c.bf16 %v1277_v50, %v1279_v54  ;;  %741 = vperm.xlu0 %1236, %v1468_v4   ;;  %737 = vperm.xlu1 %1235, %v1456_v2   ;;  %v824_v50 = vsel %vm52_vm1, 1, %v1394_v7  ;;  %v515_v52 = vpop.permute.xlu1 %514 }
 0x1e5   :  { %1290 = vtanh.f32 %v439_v55  ;;  %v1008_v57 = vpop.f32.mrb[10].mxu0 }
 0x1e6   :  { %v1281_v58 = vpop.eup %1280  ;;  %v454_v59 = vadd.f32 %v1008_v57, %v314_v48  ;;  %v448_v60 = vpop.f32.mrb[11].mxu0  ;;  %1143 = vmatprep.subr.bf16.mxu1 %v1142_v56  ;;  %v1398_v48 = vmov 5  }
 0x1e7   :  { %v1283_v61 = vpop.eup %1282  ;;  %v449_v63 = vadd.f32 %v448_v60, %v310_v51  ;;  %1145 = vmatpush3.bf16.msra.mxu1 %v1142_v56  ;;  %v511_v51 = vpop.permute.xlu0 %510 }
 0x1e8   :  { %1292 = vtanh.f32 %v454_v59  ;;  %v1146_v0 = vpack.c.bf16 %v1281_v58, %v1283_v61  ;;  %1237 = vset.pattern.permute.xlu1 %v1398_v48  ;;  %1238 = vset.pattern.permute.xlu0 %v1399_v49  ;;  %v519_v54 = vpop.permute.xlu1 %518 }
 0x1e9   :  { %1294 = vtanh.f32 %v449_v63  ;;  %v1011_v18 = vpop.f32.mrb[12].mxu0  ;;  %826 = vperm.xlu1 %1237, %v823_v47   ;;  %846 = vperm.xlu0 %1238, %v823_v47  }
 0x1ea   :  { %v1285_v19 = vpop.eup %1284  ;;  %v464_v20 = vadd.f32 %v1011_v18, %v322_v62  ;;  %v458_v21 = vpop.f32.mrb[13].mxu0  ;;  %1147 = vmatprep.subr.bf16.mxu1 %v1146_v0 }
 0x1eb   :  { %v1287_v22 = vpop.eup %1286  ;;  %v459_v23 = vadd.f32 %v458_v21, %v318_v26  ;;  %1149 = vmatpush3.bf16.msra.mxu1 %v1146_v0  ;;  %v523_v53 = vpop.permute.xlu0 %522 }
 0x1ec   :  { %1296 = vtanh.f32 %v464_v20  ;;  %v1150_v25 = vpack.c.bf16 %v1285_v19, %v1287_v22  ;;  %v527_v55 = vpop.permute.xlu1 %526 }
 0x1ed   :  { %1298 = vtanh.f32 %v459_v23  ;;  %v1014_v28 = vpop.f32.mrb[14].mxu0  ;;  %829 = vperm.xlu1 %1237, %v824_v50  }
 0x1ee   :  { %v1289_v29 = vpop.eup %1288  ;;  %v474_v31 = vadd.f32 %v1014_v28, %v330_v27  ;;  %v468_v32 = vpop.f32.mrb[15].mxu0  ;;  %1151 = vmatprep.subr.bf16.mxu1 %v1150_v25 }
 0x1ef   :  { %v1291_v33 = vpop.eup %1290  ;;  %v469_v1 = vadd.f32 %v468_v32, %v326_v30  ;;  %1153 = vmatpush3.bf16.msra.mxu1 %v1150_v25  ;;  %v531_v2 = vpop.permute.xlu0 %530 }
 0x1f0   :  { %1300 = vtanh.f32 %v474_v31  ;;  %v1154_v6 = vpack.c.bf16 %v1289_v29, %v1291_v33  ;;  %v535_v61 = vpop.permute.xlu1 %534 }
 0x1f1   :  { %1302 = vtanh.f32 %v469_v1  ;;  %1239 = vset.pattern.permute.xlu1 %v1399_v49 }
 0x1f2   :  { %v1293_v8 = vpop.eup %1292  ;;  %1155 = vmatprep.subr.bf16.mxu1 %v1154_v6  ;;  %849 = vperm.xlu1 %1239, %v824_v50  }
 0x1f3   :  { %v1295_v3 = vpop.eup %1294  ;;  %1157 = vmatpush3.bf16.msra.mxu1 %v1154_v6  ;;  %v539_v59 = vpop.permute.xlu0 %538 }
 0x1f4   :  { %v1158_v9 = vpack.c.bf16 %v1293_v8, %v1295_v3  ;;  %v543_v21 = vpop.permute.xlu1 %542 }
 0x1f6   :  { %v1297_v10 = vpop.eup %1296  ;;  %1159 = vmatprep.subr.bf16.mxu1 %v1158_v9 }
 0x1f7   :  { %v1299_v11 = vpop.eup %1298  ;;  %1161 = vmatpush3.bf16.msra.mxu1 %v1158_v9  ;;  %v547_v19 = vpop.permute.xlu0 %546 }
 0x1f8   :  { %v1162_v13 = vpack.c.bf16 %v1297_v10, %v1299_v11  ;;  %v551_v1 = vpop.permute.xlu1 %550 }
 0x1fa   :  { %v1301_v34 = vpop.eup %1300  ;;  %1163 = vmatprep.subr.bf16.mxu1 %v1162_v13 }
 0x1fb   :  { %v1303_v15 = vpop.eup %1302  ;;  %1165 = vmatpush3.bf16.msra.mxu1 %v1162_v13  ;;  %v555_v31 = vpop.permute.xlu0 %554 }
 0x1fc   :  { %v1166_v5 = vpack.c.bf16 %v1301_v34, %v1303_v15 }
 0x1fe   :  { %1167 = vmatprep.subr.bf16.mxu1 %v1166_v5 }
 0x1ff   :  { %1169 = vmatpush3.bf16.msra.mxu1 %v1166_v5 }
 0x202   :  { %1048 = vmatmul.mubr.f32.vlgmr.msra.gmra.mrb[0].mxu1 %v494_v12  ;;  %v563_v12 = vpop.permute.xlu0 %562 }
 0x203   :  { %1050 = vmatprep.mubr.f32.mxu1 %v495_v35 }
 0x206   :  { %1051 = vmatmul.mubr.f32.gmra.mrb[2].mxu1 %v496_v16  ;;  %v559_v16 = vpop.permute.xlu1 %558 }
 0x207   :  { %1053 = vmatprep.mubr.f32.mxu1 %v497_v36 }
 0x20a   :  { %1054 = vmatmul.mubr.f32.gmra.mrb[4].mxu1 %v498_v17 }
 0x20b   :  { %1056 = vmatprep.mubr.f32.mxu1 %v499_v14 }
 0x20e   :  { %1057 = vmatmul.mubr.f32.gmra.mrb[6].mxu1 %v500_v37 }
 0x20f   :  { %1059 = vmatprep.mubr.f32.mxu1 %v501_v38 }
 0x212   :  { %1060 = vmatmul.mubr.f32.gmra.mrb[8].mxu1 %v502_v39 }
 0x213   :  { %1062 = vmatprep.mubr.f32.mxu1 %v503_v40 }
 0x216   :  { %1063 = vmatmul.mubr.f32.gmra.mrb[10].mxu1 %v504_v41 }
 0x217   :  { %1065 = vmatprep.mubr.f32.mxu1 %v505_v42  ;;  %v571_v42 = vpop.permute.xlu0 %570 }
 0x21a   :  { %1066 = vmatmul.mubr.f32.gmra.mrb[12].mxu1 %v506_v43 }
 0x21b   :  { %1068 = vmatprep.mubr.f32.mxu1 %v507_v44 }
 0x21e   :  { %1069 = vmatmul.mubr.f32.gmra.mrb[14].mxu1 %v508_v45  ;;  %v567_v45 = vpop.permute.xlu1 %566 }
 0x2d5   :  { %v1049_v56 = vpop.f32.mrb[0].mxu1 }
 0x2d6   :  { %v645_v57 = vadd.f32 %v1049_v56, %v515_v52  ;;  %v639_v4 = vpop.f32.mrb[1].mxu1 }
 0x2d7   :  { %v640_v58 = vadd.f32 %v639_v4, %v511_v51  ;;  %v735_v4 = vld [vmem:[%s1715_s4 + $0x8] sm:$0xff]  ;;  %s1400_s4 = smov [#allocation5]  }
 0x2d8   :  { %1304 = vtanh.f32 %v645_v57  ;;  %s864_s23 = sshll.u32 %s1400_s4, 4  ;;  %s865_s23 = int_to_ptr.vmem [resolvable:$true] %s864_s23 }
 0x2d9   :  { %1306 = vtanh.f32 %v640_v58  ;;  %v1052_v60 = vpop.f32.mrb[2].mxu1  ;;  %v742_v58 = vpop.permute.xlu0 %741  ;;  %s1364_s24 = scalar_lea.vmem %s865_s23, 256  ;;  %p1369_p9 = scmp.lt.s32.totalorder %s865_s23, %s865_s23 }
 0x2da   :  { %v655_v62 = vadd.f32 %v1052_v60, %v523_v53  ;;  %v649_v7 = vpop.f32.mrb[3].mxu1  ;;  %p1365_p8 = scmp.ne.s32.totalorder %s865_s23, %s1364_s24  ;;  %p1370_p10 = scmp.lt.s32.totalorder %s1364_s24, %s1364_s24 }
 0x2db   :  { %v650_v63 = vadd.f32 %v649_v7, %v519_v54 }
 0x2dc   :  { %1308 = vtanh.f32 %v655_v62  ;;  %p1371_p11 = por %p1370_p10, %p1369_p9 }
 0x2dd   :  { %1310 = vtanh.f32 %v650_v63  ;;  %v1055_v26 = vpop.f32.mrb[4].mxu1 }
 0x2de   :  { %v665_v0 = vadd.f32 %v1055_v26, %v531_v2  ;;  %v659_v18 = vpop.f32.mrb[5].mxu1  ;;  %p1372_p12 = pnand %p1371_p11, %p1365_p8 }
 0x2df   :  { %v660_v20 = vadd.f32 %v659_v18, %v527_v55 }
 0x2e0   :  { %1312 = vtanh.f32 %v665_v0 }
 0x2e1   :  { %1314 = vtanh.f32 %v660_v20  ;;  %v1058_v22 = vpop.f32.mrb[6].mxu1 }
 0x2e2   :  { %v1305_v23 = vpop.eup %1304  ;;  %v675_v25 = vadd.f32 %v1058_v22, %v539_v59  ;;  %v669_v27 = vpop.f32.mrb[7].mxu1 }
 0x2e3   :  { %v1307_v28 = vpop.eup %1306  ;;  %v670_v29 = vadd.f32 %v669_v27, %v535_v61  ;;  %v738_v59 = vpop.permute.xlu1 %737 }
 0x2e4   :  { %1316 = vtanh.f32 %v675_v25  ;;  %v1170_v30 = vpack.c.bf16 %v1305_v23, %v1307_v28 }
 0x2e5   :  { %1318 = vtanh.f32 %v670_v29  ;;  %v1061_v32 = vpop.f32.mrb[8].mxu1 }
 0x2e6   :  { %v1309_v33 = vpop.eup %1308  ;;  %v685_v6 = vadd.f32 %v1061_v32, %v547_v19  ;;  %v679_v8 = vpop.f32.mrb[9].mxu1  ;;  %1171 = vmatprep.subr.bf16.mxu0 %v1170_v30 }
 0x2e7   :  { %v1311_v3 = vpop.eup %1310  ;;  %v680_v9 = vadd.f32 %v679_v8, %v543_v21  ;;  %1173 = vmatpush3.bf16.msra.mxu0 %v1170_v30  ;;  %v827_v0 = vpop.permute.xlu1 %826 }
 0x2e8   :  { %1320 = vtanh.f32 %v685_v6  ;;  %v1174_v10 = vpack.c.bf16 %v1309_v33, %v1311_v3  ;;  %vm831_vm3 = vcmp.eq.s32.totalorder %v827_v0, 1  ;;  %v847_v33 = vpop.permute.xlu0 %846 }
 0x2e9   :  { %1322 = vtanh.f32 %v680_v9  ;;  %v1064_v11 = vpop.f32.mrb[10].mxu1  ;;  %vm851_vm5 = vcmp.eq.s32.totalorder %v847_v33, 1 }
 0x2ea   :  { %v1313_v13 = vpop.eup %1312  ;;  %v695_v34 = vadd.f32 %v1064_v11, %v555_v31  ;;  %v689_v15 = vpop.f32.mrb[11].mxu1  ;;  %1175 = vmatprep.subr.bf16.mxu0 %v1174_v10 }
 0x2eb   :  { %v1315_v5 = vpop.eup %1314  ;;  %v690_v35 = vadd.f32 %v689_v15, %v551_v1  ;;  %1177 = vmatpush3.bf16.msra.mxu0 %v1174_v10  ;;  %v830_v18 = vpop.permute.xlu1 %829 }
 0x2ec   :  { %1324 = vtanh.f32 %v695_v34  ;;  %v1178_v36 = vpack.c.bf16 %v1313_v13, %v1315_v5  ;;  %vm832_vm2 = vcmp.eq.s32.totalorder %v830_v18, 1 }
 0x2ed   :  { %1326 = vtanh.f32 %v690_v35  ;;  %v1067_v17 = vpop.f32.mrb[12].mxu1 }
 0x2ee   :  { %v1317_v14 = vpop.eup %1316  ;;  %v705_v37 = vadd.f32 %v1067_v17, %v563_v12  ;;  %v699_v38 = vpop.f32.mrb[13].mxu1  ;;  %1179 = vmatprep.subr.bf16.mxu0 %v1178_v36 }
 0x2ef   :  { %v1319_v39 = vpop.eup %1318  ;;  %v700_v40 = vadd.f32 %v699_v38, %v559_v16  ;;  %1181 = vmatpush3.bf16.msra.mxu0 %v1178_v36  ;;  %v850_v32 = vpop.permute.xlu1 %849 }
 0x2f0   :  { %1328 = vtanh.f32 %v705_v37  ;;  %v1182_v41 = vpack.c.bf16 %v1317_v14, %v1319_v39  ;;  %vm852_vm4 = vcmp.eq.s32.totalorder %v850_v32, 1 }
 0x2f1   :  { %1330 = vtanh.f32 %v700_v40  ;;  %v1070_v43 = vpop.f32.mrb[14].mxu1 }
 0x2f2   :  { %v1321_v44 = vpop.eup %1320  ;;  %v715_v24 = vadd.f32 %v1070_v43, %v571_v42  ;;  %v709_v46 = vpop.f32.mrb[15].mxu1  ;;  %1183 = vmatprep.subr.bf16.mxu0 %v1182_v41 }
 0x2f3   :  { %v1323_v47 = vpop.eup %1322  ;;  %v710_v48 = vadd.f32 %v709_v46, %v567_v45  ;;  %1185 = vmatpush3.bf16.msra.mxu0 %v1182_v41 }
 0x2f4   :  { %1332 = vtanh.f32 %v715_v24  ;;  %v1186_v49 = vpack.c.bf16 %v1321_v44, %v1323_v47 }
 0x2f5   :  { %1334 = vtanh.f32 %v710_v48 }
 0x2f6   :  { %v1325_v50 = vpop.eup %1324  ;;  %1187 = vmatprep.subr.bf16.mxu0 %v1186_v49 }
 0x2f7   :  { %v1327_v51 = vpop.eup %1326  ;;  %1189 = vmatpush3.bf16.msra.mxu0 %v1186_v49 }
 0x2f8   :  { %v1190_v52 = vpack.c.bf16 %v1325_v50, %v1327_v51 }
 0x2fa   :  { %v1329_v53 = vpop.eup %1328  ;;  %1191 = vmatprep.subr.bf16.mxu0 %v1190_v52 }
 0x2fb   :  { %v1331_v54 = vpop.eup %1330  ;;  %1193 = vmatpush3.bf16.msra.mxu0 %v1190_v52 }
 0x2fc   :  { %v1194_v2 = vpack.c.bf16 %v1329_v53, %v1331_v54 }
 0x2fe   :  { %v1333_v55 = vpop.eup %1332  ;;  %1195 = vmatprep.subr.bf16.mxu0 %v1194_v2 }
 0x2ff   :  { %v1335_v56 = vpop.eup %1334  ;;  %1197 = vmatpush3.bf16.msra.mxu0 %v1194_v2 }
 0x300   :  { %v1198_v57 = vpack.c.bf16 %v1333_v55, %v1335_v56 }
 0x302   :  { %1199 = vmatprep.subr.bf16.mxu0 %v1198_v57 }
 0x303   :  { %1201 = vmatpush3.bf16.msra.mxu0 %v1198_v57 }
 0x306   :  { %1104 = vmatmul.mubr.f32.vlgmr.msra.gmra.mrb[16].mxu0 %v735_v4 }
 0x3d9   :  { %v1105_v60 = vpop.f32.mrb[16].mxu0 }
 0x3da   :  { %v816_v61 = vadd.f32 %v1105_v60, %v742_v58  ;;  %v810_v62 = vpop.f32.mrb[17].mxu0 }
 0x3db   :  { %v811_v7 = vadd.f32 %v810_v62, %v738_v59 }
 0x3dc   :  { %v821_v63 = vmul.f32 1.442695, %v816_v61 }
 0x3dd   :  { %v819_v26 = vmul.f32 1.442695, %v811_v7 }
 0x3de   :  { %1336 = vpow2.f32 %v821_v63 }
 0x3df   :  { %1338 = vpow2.f32 %v819_v26 }
 0x3e8   :  { %v1337_v19 = vpop.eup %1336 }
 0x3e9   :  { %v1339_v20 = vpop.eup %1338  ;;  %v834_v21 = vsel %vm832_vm2, %v1337_v19, 0.0  ;;  %v854_v3 = vsel %vm852_vm4, %v816_v61, %v1337_v19 }
 0x3ea   :  { %v833_v22 = vsel %vm831_vm3, %v1339_v20, 0.0  ;;  %v853_v9 = vsel %vm851_vm5, %v811_v7, %v1339_v20 }
 0x3eb   :  { %v835_v23 = vadd.f32 %v834_v21, %v833_v22 }
 0x3ed   :  { %v836_v25 = vrot.slane %v835_v23, 4 }
 0x3ef   :  { %v837_v27 = vadd.f32 %v836_v25, %v835_v23 }
 0x3f1   :  { %v838_v28 = vrot.slane %v837_v27, 2 }
 0x3f3   :  { %v839_v29 = vadd.f32 %v838_v28, %v837_v27 }
 0x3f5   :  { %v840_v30 = vrot.slane %v839_v29, 1 }
 0x3f7   :  { %v841_v31 = vadd.f32 %v840_v30, %v839_v29 }
 0x3f9   :  { %1340 = vrcp.f32 %v841_v31 }
 0x403   :  { %v1341_v1 = vpop.eup %1340 }
 0x404   :  { %v844_v6 = vmul.f32 %v1341_v1, %v1337_v19  ;;  %v843_v8 = vmul.f32 %v1341_v1, %v1339_v20 }
 0x406   :  { %v856_v10 = vsel %vm832_vm2, %v844_v6, %v854_v3  ;;  %v855_v11 = vsel %vm831_vm3, %v843_v8, %v853_v9 }
 0x407   :  { %858 = vst [vmem:[#allocation5 + $0x8] sm:$0xff] %v856_v10  ;;  %857 = vst [vmem:[#allocation5] sm:$0xff] %v855_v11 }
 0x408   :  { %1375 = shalt.err (!%p1372_p12)
}
 0x409   :  { %s1376_s27 = scalar_lea.hbm %s1716_s5, 256 }
 0x40a   :  { %p1377_p13 = scmp.ne.s32.totalorder %s1716_s5, %s1376_s27  ;;  %p1380_p0 = scmp.lt.u32.totalorder %s1376_s27, %s1716_s5 }
 0x40c   :  { %p1382_p1 = pnand %p1380_p0, %p1377_p13 }
 0x40e   :  { %1385 = shalt.err (!%p1382_p1)
}
 0x40f   :  { %870 = dma.vmem_to_hbm [thread:$0]  %s865_s23, 256, %s1716_s5, [#allocation4], %s1391_s28, %s1391_s28, %s1392_s29  }
 0x410   :  { %1388 = dma.done.wait [#allocation4], 256  }
 0x411   :  { %1389 = vsyncadd [#allocation4], 4294967040 }
 0x412   :  { %874 = vsyncpa [#allocation3], 1 }
 0x413   :  { %875 = vsyncpa [#allocation4], 1 }

</bundles_post_ra>
